<compile_context>
chip_gen: v7x
topology: tpu7x:2x2x1
jax: 0.10.0
libtpu: 0.0.40
codegen_flags: <defaults>
</compile_context>

<pallas_src>
import jax
import jax.numpy as jnp
from jax.experimental import pallas as pl
from jax.experimental.pallas import tpu as pltpu


def linear_clamp_kernel(x_ref, w_ref, b_ref, o_ref):
    # x_ref: (B_TILE, K)  w_ref: (K, N)  b_ref: (1, N)  o_ref: (B_TILE, N)
    acc = jnp.dot(x_ref[...], w_ref[...],
                  preferred_element_type=jnp.float32)   # MXU
    acc = acc + b_ref[...]                               # bias: one VPU add
    acc = jnp.maximum(acc, 0.0)                          # clamp_min(0)
    acc = jnp.minimum(acc, 5.0)                          # clamp_max(5)
    o_ref[...] = acc.astype(o_ref.dtype)


def linear_clamp(x, w, b2d, *, b_tile=1024):
    """x: (B, K) f32, w: (K, N) f32, b2d: (1, N) f32 -> clamp(x @ w + b, 0, 5)."""
    B, K = x.shape
    K2, N = w.shape
    assert K == K2 and b2d.shape == (1, N)
    B_TILE = min(B, b_tile)
    grid = (pl.cdiv(B, B_TILE),)

    return pl.pallas_call(
        linear_clamp_kernel,
        out_shape=jax.ShapeDtypeStruct((B, N), jnp.float32),
        grid=grid,
        in_specs=[
            pl.BlockSpec((B_TILE, K), lambda i: (i, 0)),   # batch-tiled input
            pl.BlockSpec((K, N), lambda i: (0, 0)),        # weights (resident)
            pl.BlockSpec((1, N), lambda i: (0, 0)),        # bias (resident)
        ],
        out_specs=pl.BlockSpec((B_TILE, N), lambda i: (i, 0)),
        compiler_params=pltpu.CompilerParams(
            dimension_semantics=("parallel",)),
    )(x, w, b2d)


if __name__ == "__main__":
    key = jax.random.PRNGKey(0)
    kx, kw, kb = jax.random.split(key, 3)

    in_features, out_features = 6, 16
    # Small batch of 8 rows (f32 sublane multiple); each row computes exactly
    # what Model.forward computes for the original (1, 6) input.
    B = 8
    x1 = jax.random.normal(kx, (B, in_features), dtype=jnp.float32)

    # Deterministic PyTorch-style Linear init (uniform +/- 1/sqrt(in_features))
    bound = 1.0 / jnp.sqrt(jnp.float32(in_features))
    w_torch_layout = jax.random.uniform(
        kw, (out_features, in_features), minval=-bound, maxval=bound,
        dtype=jnp.float32)
    b = jax.random.uniform(
        kb, (out_features,), minval=-bound, maxval=bound, dtype=jnp.float32)

    # One-time static parameter prep (NOT in the per-call path):
    w = jnp.asarray(w_torch_layout.T)        # (6, 16) so the kernel does x @ w
    b2d = b.reshape(1, out_features)         # (1, 16) bias row for VMEM

    linear_clamp_jit = jax.jit(linear_clamp)
    out = linear_clamp_jit(x1, w, b2d)
    jax.block_until_ready(out)

    # Sanity check against a plain-JAX reference of the PyTorch forward.
    ref = jnp.clip(x1 @ w + b[None, :], 0.0, 5.0)
    assert out.shape == (B, out_features)
    assert jnp.allclose(out, ref, atol=1e-5), "mismatch vs reference"
    print("KERNEL_OK")
</pallas_src>

<mosaic_0001>
module attributes {stable_mosaic.version = 11 : i64} {
  func.func @linear_clamp_kernel(%arg0: i32, %arg1: memref<8x6xf32, #tpu.memory_space<vmem>>, %arg2: memref<6x16xf32, #tpu.memory_space<vmem>>, %arg3: memref<1x16xf32, #tpu.memory_space<vmem>>, %arg4: memref<8x16xf32, #tpu.memory_space<vmem>>) attributes {dimension_semantics = [#tpu.dimension_semantics<parallel>], iteration_bounds = array<i64: 1>, scalar_prefetch = 0 : i64, scratch_operands = 0 : i64, tpu.core_type = #tpu.core_type<tc>, window_params = [{transform_indices = @transform_0, window_bounds = array<i64: 8, 6>}, {pipeline_mode = #tpu.pipeline_mode<synchronous>, transform_indices = @transform_1, window_bounds = array<i64: 6, 16>}, {pipeline_mode = #tpu.pipeline_mode<synchronous>, transform_indices = @transform_2, window_bounds = array<i64: 1, 16>}, {transform_indices = @transform_3, window_bounds = array<i64: 8, 16>}]} {
    %c0 = arith.constant 0 : index
    %c0_0 = arith.constant 0 : index
    %0 = vector.load %arg1[%c0, %c0_0] : memref<8x6xf32, #tpu.memory_space<vmem>>, vector<8x6xf32>
    %c0_1 = arith.constant 0 : index
    %c0_2 = arith.constant 0 : index
    %1 = vector.load %arg2[%c0_1, %c0_2] : memref<6x16xf32, #tpu.memory_space<vmem>>, vector<6x16xf32>
    %cst = arith.constant dense<0.000000e+00> : vector<8x16xf32>
    %2 = tpu.matmul %0, %1, %cst {dimension_numbers = #tpu.dot_dimension_numbers<[1], [0], [0], [1], [0, 0, 1, 1], [], []>} : vector<8x6xf32>, vector<6x16xf32>, vector<8x16xf32> -> vector<8x16xf32>
    %c0_3 = arith.constant 0 : index
    %c0_4 = arith.constant 0 : index
    %3 = vector.load %arg3[%c0_3, %c0_4] : memref<1x16xf32, #tpu.memory_space<vmem>>, vector<1x16xf32>
    %4 = vector.broadcast %3 : vector<1x16xf32> to vector<8x16xf32>
    %5 = arith.addf %2, %4 : vector<8x16xf32>
    %cst_5 = arith.constant 0.000000e+00 : f32
    %6 = vector.broadcast %cst_5 : f32 to vector<8x16xf32>
    %7 = arith.maximumf %5, %6 : vector<8x16xf32>
    %cst_6 = arith.constant 5.000000e+00 : f32
    %8 = vector.broadcast %cst_6 : f32 to vector<8x16xf32>
    %9 = arith.minimumf %7, %8 : vector<8x16xf32>
    %c0_7 = arith.constant 0 : index
    %c0_8 = arith.constant 0 : index
    %10 = vector.load %arg4[%c0_7, %c0_8] : memref<8x16xf32, #tpu.memory_space<vmem>>, vector<8x16xf32>
    tpu.vector_store %arg4[%c0_7, %c0_8], %9 {strides = array<i32>} : memref<8x16xf32, #tpu.memory_space<vmem>>, vector<8x16xf32>,
    return
  }
  func.func @transform_0(%arg0: i32) -> (i32, i32) {
    %c0_i32 = arith.constant 0 : i32
    %c0_i32_0 = arith.constant 0 : i32
    return %arg0, %c0_i32 : i32, i32
  }
  func.func @transform_1(%arg0: i32) -> (i32, i32) {
    %c0_i32 = arith.constant 0 : i32
    %c0_i32_0 = arith.constant 0 : i32
    %c0_i32_1 = arith.constant 0 : i32
    return %c0_i32, %c0_i32_0 : i32, i32
  }
  func.func @transform_2(%arg0: i32) -> (i32, i32) {
    %c0_i32 = arith.constant 0 : i32
    %c0_i32_0 = arith.constant 0 : i32
    %c0_i32_1 = arith.constant 0 : i32
    return %c0_i32, %c0_i32_0 : i32, i32
  }
  func.func @transform_3(%arg0: i32) -> (i32, i32) {
    %c0_i32 = arith.constant 0 : i32
    %c0_i32_0 = arith.constant 0 : i32
    return %arg0, %c0_i32 : i32, i32
  }
}

</mosaic_0001>

<bundles_post_ra>
// kernel: linear_clamp.1
= control target key start
LH: loop header
LB: loop body
LE: loop exit
PB: predicated region body
PF: predicated region fallthrough
CT: control target
= control target key end

     0   :  { %8 = vsyncpa [#allocation3], 0  ;;  %s297_s0 = inlined_call_operand.hbm [shape: f32[8,6], index: 0, kind: input, shape index: {}]   ;;  %s298_s1 = inlined_call_operand.hbm [shape: f32[6,16], index: 1, kind: input, shape index: {}]   ;;  %s299_s2 = inlined_call_operand.vmem [shape: f32[1,16], index: 2, kind: input, shape index: {}]   ;;  %s300_s3 = inlined_call_operand.hbm [shape: f32[8,16], index: 3, kind: output, shape index: {}]  }
   0x1   :  { %9 = vsyncpa [#allocation6], 0 }
   0x2   :  { %10 = vsyncpa [#allocation4], 0  ;;  %s233_s12 = smov [#allocation2]   ;;  %s234_s14 = smov [#allocation5]  }
   0x3   :  { %s17_s13 = sshll.u32 %s233_s12, 4  ;;  %s27_s15 = sshll.u32 %s234_s14, 4  ;;  %s18_s13 = int_to_ptr.vmem [resolvable:$true] %s17_s13  ;;  %s28_s15 = int_to_ptr.vmem [resolvable:$true] %s27_s15 }
   0x4   :  { %s161_s18 = scalar_lea.hbm %s297_s0, 128 }
   0x5   :  { %p162_p0 = scmp.ne.s32.totalorder %s297_s0, %s161_s18  ;;  %p165_p1 = scmp.lt.u32.totalorder %s161_s18, %s297_s0 }
   0x7   :  { %p167_p2 = pnand %p165_p1, %p162_p0 }
   0x9   :  { %170 = shalt.err (!%p167_p2)
}
   0xa   :  { %s171_s23 = scalar_lea.vmem %s18_s13, 128  ;;  %p176_p4 = scmp.lt.s32.totalorder %s18_s13, %s18_s13 }
   0xb   :  { %p172_p3 = scmp.ne.s32.totalorder %s18_s13, %s171_s23  ;;  %p177_p5 = scmp.lt.s32.totalorder %s171_s23, %s171_s23 }
   0xd   :  { %p178_p6 = por %p177_p5, %p176_p4 }
   0xf   :  { %p179_p7 = pnand %p178_p6, %p172_p3 }
  0x11   :  { %182 = shalt.err (!%p179_p7)
}
  0x12   :  { %20 = dma.hbm_to_vmem [thread:$0]  %s297_s0, 128, %s18_s13, [#allocation3]  }
  0x13   :  { %s183_s28 = scalar_lea.hbm %s298_s1, 128 }
  0x14   :  { %p184_p8 = scmp.ne.s32.totalorder %s298_s1, %s183_s28  ;;  %p187_p9 = scmp.lt.u32.totalorder %s183_s28, %s298_s1 }
  0x16   :  { %p189_p10 = pnand %p187_p9, %p184_p8 }
  0x18   :  { %192 = shalt.err (!%p189_p10)
}
  0x19   :  { %s193_s6 = scalar_lea.vmem %s28_s15, 128  ;;  %p198_p12 = scmp.lt.s32.totalorder %s28_s15, %s28_s15 }
  0x1a   :  { %p194_p11 = scmp.ne.s32.totalorder %s28_s15, %s193_s6  ;;  %p199_p13 = scmp.lt.s32.totalorder %s193_s6, %s193_s6 }
  0x1c   :  { %p200_p0 = por %p199_p13, %p198_p12 }
  0x1e   :  { %p201_p1 = pnand %p200_p0, %p194_p11 }
  0x20   :  { %204 = shalt.err (!%p201_p1)
}
  0x21   :  { %30 = dma.hbm_to_vmem [thread:$0]  %s298_s1, 128, %s28_s15, [#allocation6]  }
  0x22   :  { %227 = dma.done.wait [#allocation3], 128  }
  0x23   :  { %228 = vsyncadd [#allocation3], 4294967168 }
  0x24   :  { %229 = dma.done.wait [#allocation6], 128  }
  0x25   :  { %230 = vsyncadd [#allocation6], 4294967168  ;;  %v235_v0 = vmov 0.0   ;;  %vm236_vm0 = vmmov 0   ;;  %vm52_vm1 = vcmask 1045504   ;;  %vm48_vm2 = vcmask 48128  }
  0x26   :  { %151 = vmatprep.subr.mxu0 %v235_v0  ;;  %153 = vmatprep.mubr.msk.f32.mxu0 %vm236_vm0, %v235_v0  ;;  %v40_v1 = vld [vmem:[#allocation5] sm:$0x3f]  ;;  %v39_v2 = vld [vmem:[#allocation2] sm:$0xff]  ;;  %s237_s1 = smov [#allocation7]   ;;  %vm128_vm3 = vcmask 130048  }
  0x27   :  { %152 = vmatpush3.msk.msra.mxu0 %vm52_vm1, %v40_v1  ;;  %v146_v3 = vld [vmem:[%s299_s2] ss:$0 sm:$0xff]  ;;  %s136_s10 = sshll.u32 %s237_s1, 4  ;;  %s137_s10 = int_to_ptr.vmem [resolvable:$true] %s136_s10 }
  0x28   :  { %154 = vmatmul.mubr.msk.f32.vlgmr.msra.gmra.mrb[0].mxu0 %vm48_vm2, %v39_v2  ;;  %s205_s11 = scalar_lea.vmem %s137_s10, 128  ;;  %p210_p3 = scmp.lt.s32.totalorder %s137_s10, %s137_s10 }
  0x29   :  { %p206_p2 = scmp.ne.s32.totalorder %s137_s10, %s205_s11  ;;  %p211_p4 = scmp.lt.s32.totalorder %s205_s11, %s205_s11 }
  0x2b   :  { %p212_p5 = por %p211_p4, %p210_p3 }
  0x2d   :  { %p213_p6 = pnand %p212_p5, %p206_p2 }
  0xfb   :  { %v122_v4 = vpop.f32.mrb[0].mxu0 }
  0xfc   :  { %v123_v5 = vadd.f32 %v146_v3, %v122_v4  ;;  %v155_v6 = vpop.f32.mrb[1].mxu0 }
  0xfe   :  { %v126_v7 = vmax.f32 %v123_v5, 0.0 }
 0x100   :  { %v127_v8 = vmin.f32 %v126_v7, 5.0 }
 0x102   :  { %129 = vst.msk [vmem:[#allocation7] sm:$0xff] %vm128_vm3, %v127_v8 }
 0x103   :  { %216 = shalt.err (!%p213_p6)
}
 0x104   :  { %s217_s2 = scalar_lea.hbm %s300_s3, 128 }
 0x105   :  { %p218_p7 = scmp.ne.s32.totalorder %s300_s3, %s217_s2  ;;  %p221_p8 = scmp.lt.u32.totalorder %s217_s2, %s300_s3 }
 0x107   :  { %p223_p9 = pnand %p221_p8, %p218_p7 }
 0x109   :  { %226 = shalt.err (!%p223_p9)
}
 0x10a   :  { %139 = dma.vmem_to_hbm [thread:$0]  %s137_s10, 128, %s300_s3, [#allocation4]  }
 0x10b   :  { %231 = dma.done.wait [#allocation4], 128  }
 0x10c   :  { %232 = vsyncadd [#allocation4], 4294967168 }
 0x10d   :  { %143 = vsyncpa [#allocation3], 1 }
 0x10e   :  { %144 = vsyncpa [#allocation6], 1 }
 0x10f   :  { %145 = vsyncpa [#allocation4], 1 }

</bundles_post_ra>
